<compile_context>
chip_gen: v5e
topology: v5e:2x2
jax: 0.10.0
libtpu: 0.0.40
codegen_flags: <defaults>
</compile_context>

<pallas_src>
import functools

import jax
import jax.numpy as jnp
from jax.experimental import pallas as pl
from jax.experimental.pallas import tpu as pltpu

_LANE = 128  # lane width: hidden/embedding dims are padded to this


# ------------------------------ fused kernel ------------------------------


def _clip_fused_kernel(
    xt_ref,    # (BB*S, Hp)  bf16  token embeddings (batch-major rows)
    mk_ref,    # (BB, 1, S)  f32   attention mask
    w1_ref,    # (Hp, Hp)    bf16  text hidden weight
    b1_ref,    # (1, Hp)     f32
    wpt_ref,   # (Hp, Dp)    bf16  text projection
    bpt_ref,   # (1, Dp)     f32
    xe_ref,    # (BB, Lp, C) bf16  halo-padded raw ECG, channels innermost
    wc_ref,    # (K, C, Hp)  bf16  conv taps
    bc_ref,    # (1, Hp)     f32
    wpe_ref,   # (Hp, Dp)    bf16  ecg projection
    bpe_ref,   # (1, Dp)     f32
    ot_ref,    # (BB, 1, Dp) f32   text embedding out (lane-dense slab)
    oe_ref,    # (BB, 1, Dp) f32   ecg embedding out  (lane-dense slab)
    *,
    S, L, K,
):
    BB = mk_ref.shape[0]
    Hp = w1_ref.shape[0]
    Dp = wpt_ref.shape[1]
    C = xe_ref.shape[2]

    # ---------------------------- text branch ----------------------------
    xt = xt_ref[...]                                              # (BB*S, Hp) bf16
    h = jnp.dot(xt, w1_ref[...], preferred_element_type=jnp.float32)
    h = h + b1_ref[...]
    # tanh-approx GELU (documented deviation from exact-erf PyTorch default).
    h = jax.nn.gelu(h, approximate=True)
    h3 = h.astype(jnp.bfloat16).reshape(BB, S, Hp)                # tile-aligned split

    m = mk_ref[...]                                               # (BB, 1, S) f32
    msum = jnp.sum(m, axis=2, keepdims=True)                      # (BB, 1, 1)
    inv = pl.reciprocal(jnp.maximum(msum, 1.0), approx=True)      # EUP, ~free
    mn = (m * inv).astype(jnp.bfloat16)                           # (BB, 1, S)

    # Masked mean pooling as an MXU matmul: (BB,1,S) @ (BB,S,Hp) -> (BB,1,Hp)
    pooled_t = jnp.einsum("bks,bsh->bkh", mn, h3,
                          preferred_element_type=jnp.float32)
    pooled_t = pooled_t.reshape(BB, Hp).astype(jnp.bfloat16)
    ot = jnp.dot(pooled_t, wpt_ref[...],
                 preferred_element_type=jnp.float32) + bpt_ref[...]
    ot_ref[...] = ot.reshape(BB, 1, Dp).astype(ot_ref.dtype)

    # ----------------------------- ecg branch -----------------------------
    xe = xe_ref[...]                                              # (BB, Lp, C) bf16
    acc = jnp.zeros((BB * L, Hp), jnp.float32)
    for k in range(K):                                            # K static conv taps
        tap = xe[:, k:k + L, :].reshape(BB * L, C)                # halo'd shifted view
        acc = acc + jnp.dot(tap, wc_ref[k],
                            preferred_element_type=jnp.float32)
    hc = jnp.maximum(acc + bc_ref[...], 0.0)                      # ReLU, (BB*L, Hp)
    hc3 = hc.astype(jnp.bfloat16).reshape(BB, L, Hp)

    # Global average pool as an MXU matmul: (BB,1,L) @ (BB,L,Hp) -> (BB,1,Hp)
    poolw = jnp.full((BB, 1, L), 1.0 / L, jnp.bfloat16)
    pooled_e = jnp.einsum("bkl,blh->bkh", poolw, hc3,
                          preferred_element_type=jnp.float32)
    pooled_e = pooled_e.reshape(BB, Hp).astype(jnp.bfloat16)
    oe = jnp.dot(pooled_e, wpe_ref[...],
                 preferred_element_type=jnp.float32) + bpe_ref[...]
    oe_ref[...] = oe.reshape(BB, 1, Dp).astype(oe_ref.dtype)


# ------------------------------ model wrapper ------------------------------


def ecg_text_clip_forward(ecg_data, tokens, params, *, embed_dim, batch_block=1):
    """Mirrors ECG_Text_CLIP.forward: returns (text_embedding, ecg_embedding)."""
    ids = tokens["input_ids"]
    mask = tokens["attention_mask"]
    tp, ep = params["text"], params["ecg"]

    B, S = ids.shape
    Hp = tp["w1"].shape[0]
    Dp = tp["wp"].shape[1]
    K, C, _ = ep["wc"].shape
    Be, Ce, L = ecg_data.shape
    assert Be == B and Ce == C
    pad = K // 2
    Lp = L + 2 * pad

    BB = batch_block
    assert B % BB == 0 and (BB * S) % 8 == 0

    # Embedding gather stays in XLA at toy vocab size.
    # TODO(synk): for production vocab/hidden sizes, fold the gather into the
    # kernel via PrefetchScalarGridSpec(input_ids) + a pl.Element row-gather
    # BlockSpec on the table to avoid the (B,S,Hp) HBM round-trip.
    xt = tp["emb"][ids].reshape(B * S, Hp)                        # (B*S, Hp) bf16
    mk = mask.astype(jnp.float32).reshape(B, 1, S)                # (B, 1, S)

    # Raw halo-padded ECG (no im2col -> ~K x less HBM traffic), length-major.
    xe = jnp.pad(ecg_data.astype(jnp.bfloat16).transpose(0, 2, 1),
                 ((0, 0), (pad, pad), (0, 0)))                    # (B, Lp, C)

    kernel = functools.partial(_clip_fused_kernel, S=S, L=L, K=K)

    out_t, out_e = pl.pallas_call(
        kernel,
        out_shape=(jax.ShapeDtypeStruct((B, 1, Dp), jnp.float32),
                   jax.ShapeDtypeStruct((B, 1, Dp), jnp.float32)),
        grid=(B // BB,),
        in_specs=[
            pl.BlockSpec((BB * S, Hp), lambda b: (b, 0)),         # token embeddings
            pl.BlockSpec((BB, 1, S), lambda b: (b, 0, 0)),        # attention mask
            pl.BlockSpec((Hp, Hp), lambda b: (0, 0)),             # w1 (resident)
            pl.BlockSpec((1, Hp), lambda b: (0, 0)),              # b1
            pl.BlockSpec((Hp, Dp), lambda b: (0, 0)),             # text proj W
            pl.BlockSpec((1, Dp), lambda b: (0, 0)),              # text proj b
            pl.BlockSpec((BB, Lp, C), lambda b: (b, 0, 0)),       # halo'd ECG
            pl.BlockSpec((K, C, Hp), lambda b: (0, 0, 0)),        # conv taps
            pl.BlockSpec((1, Hp), lambda b: (0, 0)),              # conv bias
            pl.BlockSpec((Hp, Dp), lambda b: (0, 0)),             # ecg proj W
            pl.BlockSpec((1, Dp), lambda b: (0, 0)),              # ecg proj b
        ],
        out_specs=(
            pl.BlockSpec((BB, 1, Dp), lambda b: (b, 0, 0)),
            pl.BlockSpec((BB, 1, Dp), lambda b: (b, 0, 0)),
        ),
        compiler_params=pltpu.CompilerParams(
            # batch axis is embarrassingly parallel -> megacore sharding on v7x
            dimension_semantics=("parallel",),
            # sized with headroom for v7x (64 MiB physical VMEM)
            vmem_limit_bytes=32 * 1024 * 1024,
        ),
    )(xt, mk, tp["w1"], tp["b1"], tp["wp"], tp["bp"],
      xe, ep["wc"], ep["bc"], ep["wp"], ep["bp"])

    # Slice the lane-padded (B, 1, 128) slabs back to the logical (B, D).
    return out_t[:, 0, :embed_dim], out_e[:, 0, :embed_dim]


# ------------------------------- parameters --------------------------------


def init_params(key, vocab=64, hidden=32, embed_dim=32, channels=4, kernel_size=3):
    """Logical (unpadded, f32) parameters for the synthetic encoders."""
    ks = jax.random.split(key, 9)
    s = 0.1
    text = {
        "emb": s * jax.random.normal(ks[0], (vocab, hidden), jnp.float32),
        "w1":  s * jax.random.normal(ks[1], (hidden, hidden), jnp.float32),
        "b1":  s * jax.random.normal(ks[2], (1, hidden), jnp.float32),
        "wp":  s * jax.random.normal(ks[3], (hidden, embed_dim), jnp.float32),
        "bp":  s * jax.random.normal(ks[4], (1, embed_dim), jnp.float32),
    }
    ecg = {
        "wc": s * jax.random.normal(ks[5], (kernel_size, channels, hidden), jnp.float32),
        "bc": s * jax.random.normal(ks[6], (1, hidden), jnp.float32),
        "wp": s * jax.random.normal(ks[7], (hidden, embed_dim), jnp.float32),
        "bp": s * jax.random.normal(ks[8], (1, embed_dim), jnp.float32),
    }
    return {"text": text, "ecg": ecg}


def _pad2(a, rows, cols):
    return jnp.pad(a, ((0, rows - a.shape[0]), (0, cols - a.shape[1])))


def pad_params_for_kernel(params, hidden_pad=_LANE, embed_pad=_LANE):
    """Zero-pad hidden/embedding dims to 128 lanes; cast weights to bf16."""
    t, e = params["text"], params["ecg"]
    H = t["w1"].shape[0]
    Hp, Dp = hidden_pad, embed_pad
    bf = jnp.bfloat16
    text = {
        "emb": jnp.pad(t["emb"], ((0, 0), (0, Hp - H))).astype(bf),
        "w1":  _pad2(t["w1"], Hp, Hp).astype(bf),
        "b1":  _pad2(t["b1"], 1, Hp),                       # biases stay f32
        "wp":  _pad2(t["wp"], Hp, Dp).astype(bf),
        "bp":  _pad2(t["bp"], 1, Dp),
    }
    ecg = {
        "wc": jnp.pad(e["wc"], ((0, 0), (0, 0), (0, Hp - H))).astype(bf),
        "bc": _pad2(e["bc"], 1, Hp),
        "wp": _pad2(e["wp"], Hp, Dp).astype(bf),
        "bp": _pad2(e["bp"], 1, Dp),
    }
    return {"text": text, "ecg": ecg}


# ------------------------------ pure-JAX reference -------------------------


def reference_forward(ecg_data, tokens, params):
    ids = tokens["input_ids"]
    mask = tokens["attention_mask"].astype(jnp.float32)
    t = params["text"]
    x = t["emb"][ids]
    h = jax.nn.gelu(x @ t["w1"] + t["b1"], approximate=True)
    denom = jnp.maximum(mask.sum(axis=1, keepdims=True), 1.0)
    pooled = (h * mask[:, :, None]).sum(axis=1) / denom
    text_emb = pooled @ t["wp"] + t["bp"]

    e = params["ecg"]
    K = e["wc"].shape[0]
    pad = K // 2
    B, C, L = ecg_data.shape
    xp = jnp.pad(ecg_data, ((0, 0), (0, 0), (pad, pad)))
    taps = jnp.stack([xp[:, :, k:k + L] for k in range(K)], axis=0)   # (K,B,C,L)
    hc = jnp.einsum("kbcl,kcj->blj", taps, e["wc"]) + e["bc"]
    hc = jnp.maximum(hc, 0.0)
    pooled_e = hc.mean(axis=1)
    ecg_emb = pooled_e @ e["wp"] + e["bp"]
    return text_emb, ecg_emb


# ----------------------------------- main -----------------------------------


if __name__ == "__main__":
    key = jax.random.PRNGKey(0)
    k_ecg, k_ids, k_params = jax.random.split(key, 3)

    B, C, L = 2, 4, 16          # ECG: (batch, leads, length) -- PyTorch NCL
    S, V, H, D = 8, 64, 32, 32  # seq len, vocab, hidden, embedding dim

    ecg_data = jax.random.normal(k_ecg, (B, C, L), jnp.float32)
    input_ids = jax.random.randint(k_ids, (B, S), 0, V, dtype=jnp.int32)
    attention_mask = jnp.array([[1] * S, [1] * (S - 2) + [0, 0]], dtype=jnp.int32)
    tokens = {"input_ids": input_ids, "attention_mask": attention_mask}
    # TODO(synk): tokenizer/text_process (Python string ops) has no Pallas
    # equivalent; the kernel consumes pre-tokenized input_ids / attention_mask.

    params = init_params(k_params, vocab=V, hidden=H, embed_dim=D,
                         channels=C, kernel_size=3)
    kparams = pad_params_for_kernel(params)

    fwd = jax.jit(functools.partial(ecg_text_clip_forward,
                                    params=kparams, embed_dim=D, batch_block=1))
    text_embedding, ecg_embedding = fwd(ecg_data, tokens)
    jax.block_until_ready((text_embedding, ecg_embedding))

    assert text_embedding.shape == (B, D)
    assert ecg_embedding.shape == (B, D)

    # Numerical check against the unpadded f32 reference (bf16 tolerance).
    ref_t, ref_e = reference_forward(ecg_data, tokens, params)
    assert jnp.allclose(text_embedding, ref_t, rtol=5e-2, atol=5e-3), (
        float(jnp.max(jnp.abs(text_embedding - ref_t))))
    assert jnp.allclose(ecg_embedding, ref_e, rtol=5e-2, atol=5e-3), (
        float(jnp.max(jnp.abs(ecg_embedding - ref_e))))

    print("KERNEL_OK")
</pallas_src>

<mosaic_0001>
module attributes {stable_mosaic.version = 11 : i64} {
  func.func @_clip_fused_kernel(%arg0: i32, %arg1: memref<8x128xbf16, #tpu.memory_space<vmem>>, %arg2: memref<1x1x8xf32, #tpu.memory_space<vmem>>, %arg3: memref<128x128xbf16, #tpu.memory_space<vmem>>, %arg4: memref<1x128xf32, #tpu.memory_space<vmem>>, %arg5: memref<128x128xbf16, #tpu.memory_space<vmem>>, %arg6: memref<1x128xf32, #tpu.memory_space<vmem>>, %arg7: memref<1x18x4xbf16, #tpu.memory_space<vmem>>, %arg8: memref<3x4x128xbf16, #tpu.memory_space<vmem>>, %arg9: memref<1x128xf32, #tpu.memory_space<vmem>>, %arg10: memref<128x128xbf16, #tpu.memory_space<vmem>>, %arg11: memref<1x128xf32, #tpu.memory_space<vmem>>, %arg12: memref<1x1x128xf32, #tpu.memory_space<vmem>>, %arg13: memref<1x1x128xf32, #tpu.memory_space<vmem>>) attributes {dimension_semantics = [#tpu.dimension_semantics<parallel>], iteration_bounds = array<i64: 2>, scalar_prefetch = 0 : i64, scratch_operands = 0 : i64, tpu.core_type = #tpu.core_type<tc>, window_params = [{transform_indices = @transform_0, window_bounds = array<i64: 8, 128>}, {transform_indices = @transform_1, window_bounds = array<i64: 1, 1, 8>}, {pipeline_mode = #tpu.pipeline_mode<synchronous>, transform_indices = @transform_2, window_bounds = array<i64: 128, 128>}, {pipeline_mode = #tpu.pipeline_mode<synchronous>, transform_indices = @transform_3, window_bounds = array<i64: 1, 128>}, {pipeline_mode = #tpu.pipeline_mode<synchronous>, transform_indices = @transform_4, window_bounds = array<i64: 128, 128>}, {pipeline_mode = #tpu.pipeline_mode<synchronous>, transform_indices = @transform_5, window_bounds = array<i64: 1, 128>}, {transform_indices = @transform_6, window_bounds = array<i64: 1, 18, 4>}, {pipeline_mode = #tpu.pipeline_mode<synchronous>, transform_indices = @transform_7, window_bounds = array<i64: 3, 4, 128>}, {pipeline_mode = #tpu.pipeline_mode<synchronous>, transform_indices = @transform_8, window_bounds = array<i64: 1, 128>}, {pipeline_mode = #tpu.pipeline_mode<synchronous>, transform_indices = @transform_9, window_bounds = array<i64: 128, 128>}, {pipeline_mode = #tpu.pipeline_mode<synchronous>, transform_indices = @transform_10, window_bounds = array<i64: 1, 128>}, {transform_indices = @transform_11, window_bounds = array<i64: 1, 1, 128>}, {transform_indices = @transform_12, window_bounds = array<i64: 1, 1, 128>}]} {
    %c0 = arith.constant 0 : index
    %c0_0 = arith.constant 0 : index
    %0 = vector.load %arg1[%c0, %c0_0] : memref<8x128xbf16, #tpu.memory_space<vmem>>, vector<8x128xbf16>
    %c0_1 = arith.constant 0 : index
    %c0_2 = arith.constant 0 : index
    %1 = vector.load %arg3[%c0_1, %c0_2] : memref<128x128xbf16, #tpu.memory_space<vmem>>, vector<128x128xbf16>
    %cst = arith.constant dense<0.000000e+00> : vector<8x128xf32>
    %2 = tpu.matmul %0, %1, %cst {dimension_numbers = #tpu.dot_dimension_numbers<[1], [0], [0], [1], [0, 0, 1, 1], [], []>} : vector<8x128xbf16>, vector<128x128xbf16>, vector<8x128xf32> -> vector<8x128xf32>
    %c0_3 = arith.constant 0 : index
    %c0_4 = arith.constant 0 : index
    %3 = vector.load %arg4[%c0_3, %c0_4] : memref<1x128xf32, #tpu.memory_space<vmem>>, vector<1x128xf32>
    %4 = vector.broadcast %3 : vector<1x128xf32> to vector<8x128xf32>
    %5 = arith.addf %2, %4 : vector<8x128xf32>
    %6 = arith.mulf %5, %5 : vector<8x128xf32>
    %7 = arith.mulf %5, %6 : vector<8x128xf32>
    %cst_5 = arith.constant 4.471500e-02 : f32
    %8 = vector.broadcast %cst_5 : f32 to vector<8x128xf32>
    %9 = arith.mulf %8, %7 : vector<8x128xf32>
    %10 = arith.addf %5, %9 : vector<8x128xf32>
    %cst_6 = arith.constant 0.797884583 : f32
    %11 = vector.broadcast %cst_6 : f32 to vector<8x128xf32>
    %12 = arith.mulf %11, %10 : vector<8x128xf32>
    %13 = math.tanh %12 : vector<8x128xf32>
    %cst_7 = arith.constant 1.000000e+00 : f32
    %14 = vector.broadcast %cst_7 : f32 to vector<8x128xf32>
    %15 = arith.addf %14, %13 : vector<8x128xf32>
    %cst_8 = arith.constant 5.000000e-01 : f32
    %16 = vector.broadcast %cst_8 : f32 to vector<8x128xf32>
    %17 = arith.mulf %16, %15 : vector<8x128xf32>
    %18 = arith.mulf %5, %17 : vector<8x128xf32>
    %19 = arith.truncf %18 : vector<8x128xf32> to vector<8x128xbf16>
    %20 = vector.shape_cast %19 : vector<8x128xbf16> to vector<1x8x128xbf16>
    %c0_9 = arith.constant 0 : index
    %c0_10 = arith.constant 0 : index
    %c0_11 = arith.constant 0 : index
    %21 = vector.load %arg2[%c0_9, %c0_10, %c0_11] : memref<1x1x8xf32, #tpu.memory_space<vmem>>, vector<1x1x8xf32>
    %cst_12 = arith.constant dense<0.000000e+00> : vector<1x1xf32>
    %22 = vector.multi_reduction <add>, %21, %cst_12 [2] : vector<1x1x8xf32> to vector<1x1xf32>
    %23 = vector.shape_cast %22 : vector<1x1xf32> to vector<1x1x1xf32>
    %cst_13 = arith.constant 1.000000e+00 : f32
    %24 = vector.broadcast %cst_13 : f32 to vector<1x1x1xf32>
    %25 = arith.maximumf %23, %24 : vector<1x1x1xf32>
    %26 = tpu.reciprocal %25 {approx = true} : vector<1x1x1xf32> -> vector<1x1x1xf32>
    %27 = vector.broadcast %26 : vector<1x1x1xf32> to vector<1x1x8xf32>
    %28 = arith.mulf %21, %27 : vector<1x1x8xf32>
    %29 = arith.truncf %28 : vector<1x1x8xf32> to vector<1x1x8xbf16>
    "tpu.trace_start"() <{level = 10 : i32, message = "bks,bsh->bkh"}> : () -> ()
    %cst_14 = arith.constant dense<0.000000e+00> : vector<1x1x128xf32>
    %30 = tpu.matmul %29, %20, %cst_14 {dimension_numbers = #tpu.dot_dimension_numbers<[2], [1], [1], [2], [0, 0, 0, 1, 1, 2], [0], [0]>} : vector<1x1x8xbf16>, vector<1x8x128xbf16>, vector<1x1x128xf32> -> vector<1x1x128xf32>
    "tpu.trace_stop"() : () -> ()
    %31 = vector.shape_cast %30 : vector<1x1x128xf32> to vector<1x128xf32>
    %32 = arith.truncf %31 : vector<1x128xf32> to vector<1x128xbf16>
    %c0_15 = arith.constant 0 : index
    %c0_16 = arith.constant 0 : index
    %33 = vector.load %arg5[%c0_15, %c0_16] : memref<128x128xbf16, #tpu.memory_space<vmem>>, vector<128x128xbf16>
    %cst_17 = arith.constant dense<0.000000e+00> : vector<1x128xf32>
    %34 = tpu.matmul %32, %33, %cst_17 {dimension_numbers = #tpu.dot_dimension_numbers<[1], [0], [0], [1], [0, 0, 1, 1], [], []>} : vector<1x128xbf16>, vector<128x128xbf16>, vector<1x128xf32> -> vector<1x128xf32>
    %c0_18 = arith.constant 0 : index
    %c0_19 = arith.constant 0 : index
    %35 = vector.load %arg6[%c0_18, %c0_19] : memref<1x128xf32, #tpu.memory_space<vmem>>, vector<1x128xf32>
    %36 = arith.addf %34, %35 : vector<1x128xf32>
    %37 = vector.shape_cast %36 : vector<1x128xf32> to vector<1x1x128xf32>
    %c0_20 = arith.constant 0 : index
    %c0_21 = arith.constant 0 : index
    %c0_22 = arith.constant 0 : index
    %38 = vector.load %arg12[%c0_20, %c0_21, %c0_22] : memref<1x1x128xf32, #tpu.memory_space<vmem>>, vector<1x1x128xf32>
    tpu.vector_store %arg12[%c0_20, %c0_21, %c0_22], %37 {strides = array<i32>} : memref<1x1x128xf32, #tpu.memory_space<vmem>>, vector<1x1x128xf32>,
    %c0_23 = arith.constant 0 : index
    %c0_24 = arith.constant 0 : index
    %c0_25 = arith.constant 0 : index
    %39 = vector.load %arg7[%c0_23, %c0_24, %c0_25] : memref<1x18x4xbf16, #tpu.memory_space<vmem>>, vector<1x18x4xbf16>
    %cst_26 = arith.constant 0.000000e+00 : f32
    %40 = vector.broadcast %cst_26 : f32 to vector<16x128xf32>
    %41 = vector.extract_strided_slice %39 {offsets = [0, 0, 0], sizes = [1, 16, 4], strides = [1, 1, 1]} : vector<1x18x4xbf16> to vector<1x16x4xbf16>
    %42 = vector.shape_cast %41 : vector<1x16x4xbf16> to vector<16x4xbf16>
    %c0_27 = arith.constant 0 : index
    %c0_28 = arith.constant 0 : index
    %c0_29 = arith.constant 0 : index
    %43 = vector.load %arg8[%c0_27, %c0_28, %c0_29] : memref<3x4x128xbf16, #tpu.memory_space<vmem>>, vector<1x4x128xbf16>
    %44 = vector.shape_cast %43 : vector<1x4x128xbf16> to vector<4x128xbf16>
    %cst_30 = arith.constant dense<0.000000e+00> : vector<16x128xf32>
    %45 = tpu.matmul %42, %44, %cst_30 {dimension_numbers = #tpu.dot_dimension_numbers<[1], [0], [0], [1], [0, 0, 1, 1], [], []>} : vector<16x4xbf16>, vector<4x128xbf16>, vector<16x128xf32> -> vector<16x128xf32>
    %46 = arith.addf %40, %45 : vector<16x128xf32>
    %47 = vector.extract_strided_slice %39 {offsets = [0, 1, 0], sizes = [1, 16, 4], strides = [1, 1, 1]} : vector<1x18x4xbf16> to vector<1x16x4xbf16>
    %48 = vector.shape_cast %47 : vector<1x16x4xbf16> to vector<16x4xbf16>
    %c1 = arith.constant 1 : index
    %c0_31 = arith.constant 0 : index
    %c0_32 = arith.constant 0 : index
    %49 = vector.load %arg8[%c1, %c0_31, %c0_32] : memref<3x4x128xbf16, #tpu.memory_space<vmem>>, vector<1x4x128xbf16>
    %50 = vector.shape_cast %49 : vector<1x4x128xbf16> to vector<4x128xbf16>
    %cst_33 = arith.constant dense<0.000000e+00> : vector<16x128xf32>
    %51 = tpu.matmul %48, %50, %cst_33 {dimension_numbers = #tpu.dot_dimension_numbers<[1], [0], [0], [1], [0, 0, 1, 1], [], []>} : vector<16x4xbf16>, vector<4x128xbf16>, vector<16x128xf32> -> vector<16x128xf32>
    %52 = arith.addf %46, %51 : vector<16x128xf32>
    %53 = vector.extract_strided_slice %39 {offsets = [0, 2, 0], sizes = [1, 16, 4], strides = [1, 1, 1]} : vector<1x18x4xbf16> to vector<1x16x4xbf16>
    %54 = vector.shape_cast %53 : vector<1x16x4xbf16> to vector<16x4xbf16>
    %c2 = arith.constant 2 : index
    %c0_34 = arith.constant 0 : index
    %c0_35 = arith.constant 0 : index
    %55 = vector.load %arg8[%c2, %c0_34, %c0_35] : memref<3x4x128xbf16, #tpu.memory_space<vmem>>, vector<1x4x128xbf16>
    %56 = vector.shape_cast %55 : vector<1x4x128xbf16> to vector<4x128xbf16>
    %cst_36 = arith.constant dense<0.000000e+00> : vector<16x128xf32>
    %57 = tpu.matmul %54, %56, %cst_36 {dimension_numbers = #tpu.dot_dimension_numbers<[1], [0], [0], [1], [0, 0, 1, 1], [], []>} : vector<16x4xbf16>, vector<4x128xbf16>, vector<16x128xf32> -> vector<16x128xf32>
    %58 = arith.addf %52, %57 : vector<16x128xf32>
    %c0_37 = arith.constant 0 : index
    %c0_38 = arith.constant 0 : index
    %59 = vector.load %arg9[%c0_37, %c0_38] : memref<1x128xf32, #tpu.memory_space<vmem>>, vector<1x128xf32>
    %60 = vector.broadcast %59 : vector<1x128xf32> to vector<16x128xf32>
    %61 = arith.addf %58, %60 : vector<16x128xf32>
    %cst_39 = arith.constant 0.000000e+00 : f32
    %62 = vector.broadcast %cst_39 : f32 to vector<16x128xf32>
    %63 = arith.maximumf %61, %62 : vector<16x128xf32>
    %64 = arith.truncf %63 : vector<16x128xf32> to vector<16x128xbf16>
    %65 = vector.shape_cast %64 : vector<16x128xbf16> to vector<1x16x128xbf16>
    %cst_40 = arith.constant 6.250000e-02 : bf16
    %66 = vector.broadcast %cst_40 : bf16 to vector<1x1x16xbf16>
    "tpu.trace_start"() <{level = 10 : i32, message = "bkl,blh->bkh"}> : () -> ()
    %cst_41 = arith.constant dense<0.000000e+00> : vector<1x1x128xf32>
    %67 = tpu.matmul %66, %65, %cst_41 {dimension_numbers = #tpu.dot_dimension_numbers<[2], [1], [1], [2], [0, 0, 0, 1, 1, 2], [0], [0]>} : vector<1x1x16xbf16>, vector<1x16x128xbf16>, vector<1x1x128xf32> -> vector<1x1x128xf32>
    "tpu.trace_stop"() : () -> ()
    %68 = vector.shape_cast %67 : vector<1x1x128xf32> to vector<1x128xf32>
    %69 = arith.truncf %68 : vector<1x128xf32> to vector<1x128xbf16>
    %c0_42 = arith.constant 0 : index
    %c0_43 = arith.constant 0 : index
    %70 = vector.load %arg10[%c0_42, %c0_43] : memref<128x128xbf16, #tpu.memory_space<vmem>>, vector<128x128xbf16>
    %cst_44 = arith.constant dense<0.000000e+00> : vector<1x128xf32>
    %71 = tpu.matmul %69, %70, %cst_44 {dimension_numbers = #tpu.dot_dimension_numbers<[1], [0], [0], [1], [0, 0, 1, 1], [], []>} : vector<1x128xbf16>, vector<128x128xbf16>, vector<1x128xf32> -> vector<1x128xf32>
    %c0_45 = arith.constant 0 : index
    %c0_46 = arith.constant 0 : index
    %72 = vector.load %arg11[%c0_45, %c0_46] : memref<1x128xf32, #tpu.memory_space<vmem>>, vector<1x128xf32>
    %73 = arith.addf %71, %72 : vector<1x128xf32>
    %74 = vector.shape_cast %73 : vector<1x128xf32> to vector<1x1x128xf32>
    %c0_47 = arith.constant 0 : index
    %c0_48 = arith.constant 0 : index
    %c0_49 = arith.constant 0 : index
    %75 = vector.load %arg13[%c0_47, %c0_48, %c0_49] : memref<1x1x128xf32, #tpu.memory_space<vmem>>, vector<1x1x128xf32>
    tpu.vector_store %arg13[%c0_47, %c0_48, %c0_49], %74 {strides = array<i32>} : memref<1x1x128xf32, #tpu.memory_space<vmem>>, vector<1x1x128xf32>,
    return
  }
  func.func @transform_0(%arg0: i32) -> (i32, i32) {
    %c0_i32 = arith.constant 0 : i32
    %c0_i32_0 = arith.constant 0 : i32
    return %arg0, %c0_i32 : i32, i32
  }
  func.func @transform_1(%arg0: i32) -> (i32, i32, i32) {
    %c0_i32 = arith.constant 0 : i32
    %c0_i32_0 = arith.constant 0 : i32
    %c0_i32_1 = arith.constant 0 : i32
    return %arg0, %c0_i32, %c0_i32_0 : i32, i32, i32
  }
  func.func @transform_2(%arg0: i32) -> (i32, i32) {
    %c0_i32 = arith.constant 0 : i32
    %c0_i32_0 = arith.constant 0 : i32
    %c0_i32_1 = arith.constant 0 : i32
    return %c0_i32, %c0_i32_0 : i32, i32
  }
  func.func @transform_3(%arg0: i32) -> (i32, i32) {
    %c0_i32 = arith.constant 0 : i32
    %c0_i32_0 = arith.constant 0 : i32
    %c0_i32_1 = arith.constant 0 : i32
    return %c0_i32, %c0_i32_0 : i32, i32
  }
  func.func @transform_4(%arg0: i32) -> (i32, i32) {
    %c0_i32 = arith.constant 0 : i32
    %c0_i32_0 = arith.constant 0 : i32
    %c0_i32_1 = arith.constant 0 : i32
    return %c0_i32, %c0_i32_0 : i32, i32
  }
  func.func @transform_5(%arg0: i32) -> (i32, i32) {
    %c0_i32 = arith.constant 0 : i32
    %c0_i32_0 = arith.constant 0 : i32
    %c0_i32_1 = arith.constant 0 : i32
    return %c0_i32, %c0_i32_0 : i32, i32
  }
  func.func @transform_6(%arg0: i32) -> (i32, i32, i32) {
    %c0_i32 = arith.constant 0 : i32
    %c0_i32_0 = arith.constant 0 : i32
    %c0_i32_1 = arith.constant 0 : i32
    return %arg0, %c0_i32, %c0_i32_0 : i32, i32, i32
  }
  func.func @transform_7(%arg0: i32) -> (i32, i32, i32) {
    %c0_i32 = arith.constant 0 : i32
    %c0_i32_0 = arith.constant 0 : i32
    %c0_i32_1 = arith.constant 0 : i32
    %c0_i32_2 = arith.constant 0 : i32
    return %c0_i32, %c0_i32_0, %c0_i32_1 : i32, i32, i32
  }
  func.func @transform_8(%arg0: i32) -> (i32, i32) {
    %c0_i32 = arith.constant 0 : i32
    %c0_i32_0 = arith.constant 0 : i32
    %c0_i32_1 = arith.constant 0 : i32
    return %c0_i32, %c0_i32_0 : i32, i32
  }
  func.func @transform_9(%arg0: i32) -> (i32, i32) {
    %c0_i32 = arith.constant 0 : i32
    %c0_i32_0 = arith.constant 0 : i32
    %c0_i32_1 = arith.constant 0 : i32
    return %c0_i32, %c0_i32_0 : i32, i32
  }
  func.func @transform_10(%arg0: i32) -> (i32, i32) {
    %c0_i32 = arith.constant 0 : i32
    %c0_i32_0 = arith.constant 0 : i32
    %c0_i32_1 = arith.constant 0 : i32
    return %c0_i32, %c0_i32_0 : i32, i32
  }
  func.func @transform_11(%arg0: i32) -> (i32, i32, i32) {
    %c0_i32 = arith.constant 0 : i32
    %c0_i32_0 = arith.constant 0 : i32
    %c0_i32_1 = arith.constant 0 : i32
    return %arg0, %c0_i32, %c0_i32_0 : i32, i32, i32
  }
  func.func @transform_12(%arg0: i32) -> (i32, i32, i32) {
    %c0_i32 = arith.constant 0 : i32
    %c0_i32_0 = arith.constant 0 : i32
    %c0_i32_1 = arith.constant 0 : i32
    return %arg0, %c0_i32, %c0_i32_0 : i32, i32, i32
  }
}

</mosaic_0001>

<bundles_post_ra>
// kernel: ecg_text_clip_forward.1
= control target key start
LH: loop header
LB: loop body
LE: loop exit
PB: predicated region body
PF: predicated region fallthrough
CT: control target
= control target key end

     0   :  { %s1705_s0 = inlined_call_operand.vmem [shape: bf16[16,128], index: 0, kind: input, shape index: {}]   ;;  %s1706_s1 = inlined_call_operand.vmem [shape: f32[2,1,8], index: 1, kind: input, shape index: {}]   ;;  %s1707_s2 = inlined_call_operand.vmem [shape: bf16[128,128], index: 2, kind: input, shape index: {}]   ;;  %s1708_s3 = inlined_call_operand.vmem [shape: f32[1,128], index: 3, kind: input, shape index: {}]   ;;  %s1709_s4 = inlined_call_operand.hbm [shape: bf16[128,128], index: 4, kind: input, shape index: {}]   ;;  %s1710_s5 = inlined_call_operand.vmem [shape: f32[1,128], index: 5, kind: input, shape index: {}]   ;;  %s1711_s6 = inlined_call_operand.vmem [shape: bf16[2,18,4], index: 6, kind: input, shape index: {}]   ;;  %s1712_s7 = inlined_call_operand.vmem [shape: bf16[3,4,128], index: 7, kind: input, shape index: {}]   ;;  %s1713_s8 = inlined_call_operand.vmem [shape: f32[1,128], index: 8, kind: input, shape index: {}]   ;;  %s1714_s9 = inlined_call_operand.hbm [shape: bf16[128,128], index: 9, kind: input, shape index: {}]   ;;  %s1715_s10 = inlined_call_operand.vmem [shape: f32[1,128], index: 10, kind: input, shape index: {}]   ;;  %s1716_s11 = inlined_call_operand.hbm [shape: f32[2,1,128], index: 11, kind: output, shape index: {0}]   ;;  %s1717_s12 = inlined_call_operand.hbm [shape: f32[2,1,128], index: 12, kind: output, shape index: {1}]  }
   0x1   :  { %1721 = sst [smem:[#allocation17_spill]] %s1705_s0 }
   0x2   :  { %1722 = sst [smem:[#allocation18_spill]] %s1706_s1 }
   0x3   :  { %1723 = sst [smem:[#allocation19_spill]] %s1707_s2 }
   0x4   :  { %18 = vsyncpa [#allocation3], 0 }
   0x5   :  { %19 = vsyncpa [#allocation6], 0 }
   0x6   :  { %20 = vsyncpa [#allocation4], 0 }
   0x7   :  { %22 = vsyncpa [#allocation4 + $0x1], 0 }
   0x8   :  { %23 = vsyncpa [#allocation9], 0 }
   0x9   :  { %25 = vsyncpa [#allocation9 + $0x1], 0  ;;  %s1508_s21 = smov 0   ;;  %s1510_s22 = smov 0  }
   0xa   :  { %s1512_s23 = smov 0   ;;  %s1514_s24 = smov 0  }
   0xb LB: > { %1724 = sst [smem:[#allocation14_spill]] %s1432_s23  ;;  %s1529_s25 = sadd.s32 4294967295, %s1436_s24   ;;  %s1436_s24 = sphi %s1514_s24, %s1733_s24   ;;  %s1432_s23 = sphi %s1512_s23, %s1735_s23   ;;  %s1428_s22 = sphi %s1510_s22, %s1737_s22   ;;  %s1424_s21 = sphi %s1508_s21, %s1736_s21  }
   0xc   : > { %s1055_s26 = sadd.s32 4294967294, %s1436_s24   ;;  %s1533_s27 = sadd.s32 1, %s1436_s24  }
   0xd   : > { %1725 = sst [smem:[#allocation15_spill]] %s1533_s27  ;;  %s284_s28 = sadd.s32 1, %s1432_s23 }
   0xe   : > { %s281_s29 = ssub.s32 %s1436_s24, %s1533_s27  ;;  %p294_p0 = scmp.ne.s32.totalorder %s1432_s23, %s1428_s22 }
   0xf   : > { %p282_p1 = scmp.eq.s32.totalorder %s281_s29, 0  ;;  %p295_p2 = scmp.eq.s32.totalorder %s1529_s25, 1 }
  0x10   : > { %p300_p3 = scmp.ne.s32.totalorder %s1428_s22, %s1424_s21  ;;  %p301_p4 = scmp.eq.s32.totalorder %s1055_s26, 1 }
  0x11   : > { %s1544_s30 = scalar_select %p282_p1, %s1432_s23, %s284_s28  }
  0x12   : > { %p1546_p5 = por %p295_p2, %p294_p0  ;;  %p1550_p6 = por %p301_p4, %p300_p3 }
  0x13   : > { %1726 = sst [smem:[#allocation16_spill]] %s1544_s30  ;;  %p1056_p7 = scmp.ge.s32.totalorder %s1436_s24, 1 }
  0x14   : > { %p334_p8 = scmp.lt.s32.totalorder %s1436_s24, 3  ;;  %p1226_p9 = scmp.eq.s32.totalorder %s1529_s25, 0 }
  0x15   : > { %s351_s18 = sshll.u32 %s1709_s4, 4  ;;  %s1438_s19 = smov [#allocation2]   ;;  %s352_s18 = int_to_ptr.hbm [resolvable:$true] %s351_s18 }
  0x16   : > { %p1557_p10 = pnand %p1056_p7, %p334_p8  ;;  %s353_s20 = sshll.u32 %s1438_s19, 4  ;;  %s354_s20 = int_to_ptr.vmem [resolvable:$true] %s353_s20 }
  0x17   : > { %s374_s29 = sshll.u32 %s1714_s9, 4  ;;  %s1439_s30 = smov 64   ;;  %s375_s29 = int_to_ptr.hbm [resolvable:$true] %s374_s29 }
  0x18   : > { %p1212_p11 = pneg %p1557_p10  ;;  %s1440_s23 = smov 4  }
  0x19   : > { %s1441_s27 = smov [#allocation5]   ;;  %416 = sbr.rel (%p1557_p10) target bundleno = 663 (0x297), region = 64 }
  0x1a   : > { %p1213_p12 = pnand %p1226_p9, %p1212_p11  ;;  %s376_s16 = sshll.u32 %s1441_s27, 4  ;;  %s377_s16 = int_to_ptr.vmem [resolvable:$true] %s376_s16 }
  0x1c   : > { %1215 = dma.hbm_to_vmem [thread:$0]  (!%p1213_p12), %s352_s18, 1024, %s354_s20, [#allocation3], %s1439_s30, %s1439_s30, %s1440_s23  }
  0x1d   : > { %1218 = dma.hbm_to_vmem [thread:$0]  (!%p1213_p12), %s375_s29, 1024, %s377_s16, [#allocation6], %s1439_s30, %s1439_s30, %s1440_s23  }
  0x1e   : > { %1407 = dma.done.wait (%p1226_p9), [#allocation3], 1024  }
  0x1f   : > { %1409 = vsyncadd (%p1226_p9), [#allocation3], 4294966272 }
  0x20   : > { %1411 = dma.done.wait (%p1226_p9), [#allocation6], 1024  }
  0x21   : > { %1413 = vsyncadd (%p1226_p9), [#allocation6], 4294966272  ;;  %p474_p13 = scmp.lt.s32.totalorder %s1529_s25, 1  ;;  %s1730_s2 = sld [smem:[#allocation19_spill]]  ;;  %vm581_vm0 = vcmask 57344   ;;  %vm721_vm1 = vcmask 1041408  }
  0x22   : > { %s1731_s1 = sld [smem:[#allocation18_spill]]  ;;  %v1268_v12 = vld [vmem:[%s1708_s3] ss:$0 sm:$0xff]  ;;  %v1137_v14 = vld [vmem:[%s1712_s7 + $0x4] sm:$0x3]  ;;  %vm717_vm2 = vcmask 31744   ;;  %s912_s28 = scalar_lea.hbm %s1716_s11, %s1529_s25 }
  0x23   : > { %s475_s27 = scalar_select %p474_p13, %s1529_s25, 1  ;;  %v768_v18 = vsel %vm721_vm1, %v1137_v14, 0  ;;  %vm760_vm3 = vcmask 1046528   ;;  %v1130_v19 = vld [vmem:[%s1712_s7 + $0x2] sm:$0x3]  ;;  %v1189_v40 = vld [vmem:[#allocation2 + $0x38] sm:$0xff] }
  0x24   : > { %s1732_s0 = sld [smem:[#allocation17_spill]]  ;;  %777 = vmatpush.bf16.msra.mxu3 %v768_v18  ;;  %v723_v23 = vsel %vm721_vm1, %v1130_v19, 0  ;;  %vm704_vm4 = vsmask.f32 7424  ;;  %676 = vmatpush.bf16.msra.mxu2 %v1189_v40  ;;  %v1188_v41 = vld [vmem:[#allocation2 + $0x30] sm:$0xff]  ;;  %v1187_v46 = vld [vmem:[#allocation2 + $0x28] sm:$0xff] }
  0x25   : > { %s1063_s20 = sshll.u32 %s475_s27, 2  ;;  %s1199_s30 = smul.u32 12, %s475_s27  ;;  %v693_v49 = vld [vmem:[%s1712_s7] sm:$0x3]  ;;  %vm593_vm5 = vcmask 1043456   ;;  %vm589_vm6 = vcmask 64512  }
  0x26   : > { %v1186_v51 = vld [vmem:[#allocation2 + $0x20] sm:$0xff]  ;;  %v742_v52 = vsel %vm721_vm1, %v693_v49, 0  ;;  %v1185_v55 = vld [vmem:[#allocation2 + $0x18] sm:$0xff]  ;;  %v1184_v56 = vld [vmem:[#allocation2 + $0x10] sm:$0xff]  ;;  %vm802_vm7 = vcmask 130048   ;;  %s1354_s17 = scalar_lea.hbm %s1716_s11, 2 }
  0x27   : > { %v1181_v0 = vld [vmem:[%s1730_s2 + $0x38] sm:$0xff]  ;;  %v1180_v1 = vld [vmem:[%s1730_s2 + $0x30] sm:$0xff]  ;;  %v1179_v4 = vld [vmem:[%s1730_s2 + $0x28] sm:$0xff]  ;;  %v1442_v18 = vmov 1031814528  }
  0x28   : > { %s480_s18 = scalar_lea.vmem %s1731_s1, %s475_s27  ;;  %557 = vmatpush.bf16.msra.mxu0 %v1181_v0  ;;  %v1178_v5 = vld [vmem:[%s1730_s2 + $0x20] sm:$0xff]  ;;  %v1177_v6 = vld [vmem:[%s1730_s2 + $0x18] sm:$0xff]  ;;  %v1176_v7 = vld [vmem:[%s1730_s2 + $0x10] sm:$0xff]  ;;  %s485_s1 = scalar_lea.vmem %s1711_s6, %s1199_s30  ;;  %677 = vmatpush.bf16.msra.mxu2 %v1188_v41 }
  0x29   : > { %v1592_v2 = vld [vmem:[%s480_s18] sm:$0x1]  ;;  %v1175_v8 = vld [vmem:[%s1730_s2 + $0x8] sm:$0xff]  ;;  %v1198_v19 = vld [vmem:[#allocation5 + $0x38] sm:$0xff]  ;;  %s1648_s30 = sand.u32 1, %s1428_s22  }
  0x2a   : > { %v582_v3 = vsel %vm581_vm0, %v1592_v2, 0.0  ;;  %v1174_v9 = vld [vmem:[%s1730_s2] sm:$0xff]  ;;  %s477_s23 = scalar_lea.vmem %s1732_s0, %s1063_s20  ;;  %v692_v11 = vld [vmem:[%s485_s1 + $0x8] sm:$0x1]  ;;  %885 = vmatpush.bf16.msrb.mxu3 %v1198_v19  ;;  %s467_s18 = scalar_lea.vmem [#allocation7], %s1648_s30 }
  0x2b   : > { %583 = vadd.xlane.f32.xlu0 %v582_v3  ;;  %v488_v10 = vld [vmem:[%s477_s23] sm:$0xf]  ;;  %v701_v13 = vunpack.c.l.b16 %v692_v11  ;;  %v1183_v57 = vld [vmem:[#allocation2 + $0x8] sm:$0xff]  ;;  %s914_s27 = sshll.u32 %s467_s18, 4  ;;  %s916_s20 = sshll.u32 %s912_s28, 4  ;;  %s915_s27 = int_to_ptr.vmem [resolvable:$true] %s914_s27  ;;  %s917_s20 = int_to_ptr.hbm [resolvable:$true] %s916_s20 }
  0x2c   : > { %558 = vmatpush.bf16.msra.mxu0 %v1180_v1  ;;  %v1625_v15 = vld [vmem:[%s485_s1] sm:$0xff]  ;;  %678 = vmatpush.bf16.msra.mxu2 %v1187_v46  ;;  %s900_s1 = scalar_lea.sflag [#allocation4], %s1648_s30  ;;  %s1348_s29 = sshra.s32 %s917_s20, 4  ;;  %s1349_s29 = int_to_ptr.hbm [resolvable:$true] %s1348_s29 }
  0x2d   : > { %v703_v16 = vpack.c.b16 %v701_v13, %v701_v13  ;;  %v761_v21 = vrot.slane %v1625_v15, 1  ;;  %v706_v24 = vshrl.u32 %v1625_v15, 16  ;;  %v708_v25 = vshll.u32 %v1625_v15, 16  ;;  %v1182_v58 = vld [vmem:[#allocation2] sm:$0xff]  ;;  %s1350_s16 = scalar_lea.hbm %s1349_s29, 1  ;;  %p1355_p3 = scmp.lt.s32.totalorder %s1349_s29, %s1716_s11 }
  0x2e   : > { %v1269_v3 = vld [vmem:[%s1713_s8] ss:$0 sm:$0xff]  ;;  %p1351_p0 = scmp.ne.s32.totalorder %s1349_s29, %s1350_s16  ;;  %p1356_p4 = scmp.lt.s32.totalorder %s1354_s17, %s1350_s16 }
  0x2f   : > { %v762_v22 = vrot.slane %v703_v16, 1  ;;  %v713_v26 = vshll.u32 %v703_v16, 16  ;;  %v710_v29 = vrot.slane %v708_v25, 1  ;;  %v1192_v25 = vld [vmem:[#allocation5 + $0x8] sm:$0xff] }
  0x30   : > { %559 = vmatpush.bf16.msra.mxu0 %v1179_v4  ;;  %679 = vmatpush.bf16.msra.mxu2 %v1186_v51  ;;  %p1352_p1 = pnand %p1351_p0, %p1546_p5  ;;  %p1357_p7 = por %p1356_p4, %p1355_p3 }
  0x31   : > { %v763_v28 = vsel %vm760_vm3, %v761_v21, %v762_v22  ;;  %v715_v30 = vrot.slane %v713_v26, 1  ;;  %v711_v32 = vor.u32 %v710_v29, %v706_v24  ;;  %v1196_v21 = vld [vmem:[#allocation5 + $0x28] sm:$0xff]  ;;  %v1195_v22 = vld [vmem:[#allocation5 + $0x20] sm:$0xff]  ;;  %v1193_v24 = vld [vmem:[#allocation5 + $0x10] sm:$0xff] }
  0x32   : > { %1138 = vmatmul.msk.bf16.vlgmr.msra.gmra.mxu3 %vm717_vm2, %v763_v28  ;;  %v627_v26 = vld [vmem:[%s1710_s5] sm:$0x1]  ;;  %p1353_p2 = pneg %p1352_p1 }
  0x33   : > { %v716_v36 = vsel %vm704_vm4, %v711_v32, %v715_v30 }
  0x34   : > { %560 = vmatpush.bf16.msra.mxu0 %v1178_v5  ;;  %680 = vmatpush.bf16.msra.mxu2 %v1185_v55  ;;  %p1358_p8 = pnand %p1357_p7, %p1353_p2 }
  0x38   : > { %561 = vmatpush.bf16.msra.mxu0 %v1177_v6  ;;  %681 = vmatpush.bf16.msra.mxu2 %v1184_v56 }
  0x3c   : > { %562 = vmatpush.bf16.msra.mxu0 %v1176_v7  ;;  %682 = vmatpush.bf16.msra.mxu2 %v1183_v57 }
  0x40   : > { %563 = vmatpush.bf16.msra.mxu0 %v1175_v8  ;;  %683 = vmatpush.bf16.msra.mxu2 %v1182_v58 }
  0x44   : > { %564 = vmatpush.bf16.msra.mxu0 %v1174_v9 }
  0x47   : > { %565 = vmatmul.bf16.vlgmr.msra.gmra.mxu0 %v488_v10 }
  0x48   : > { %732 = vmatpush.bf16.msrb.mxu0 %v723_v23  ;;  %v1194_v23 = vld [vmem:[#allocation5 + $0x18] sm:$0xff] }
  0x57   : > { %1135 = vmatmul.msk.bf16.vlgmr.msrb.gmra.mxu0 %vm717_vm2, %v716_v36 }
  0x9e   : > { %v584_v35 = vpop.xlane.xlu0 %583 }
  0x9f   : > { %v585_v38 = vmax.f32 %v584_v35, 1.0 }
  0xb5   : > { %v779_v63 = vpop.f32.mrf.mxu3 }
  0xbd   : > { %v781_v8 = vpop.f32.mrf.mxu3 }
  0xc4   : > { %v566_v17 = vpop.f32.mrf.mxu0 }
  0xc5   : > { %v567_v20 = vadd.f32 %v1268_v12, %v566_v17 }
  0xc7   : > { %v570_v27 = vmul.f32 %v567_v20, %v567_v20 }
  0xc9   : > { %v571_v31 = vmul.f32 %v570_v27, %v567_v20  ;;  %v1191_v27 = vld [vmem:[#allocation5] sm:$0xff] }
  0xcb   : > { %v572_v33 = vmul.f32 0.044715, %v571_v31 }
  0xcc   : > { %v568_v34 = vpop.f32.mrf.mxu0 }
  0xcd   : > { %v573_v37 = vadd.f32 %v572_v33, %v567_v20 }
  0xcf   : > { %v574_v39 = vmul.f32 0.7978846, %v573_v37 }
  0xd1   : > { %1270 = vtanh.f32 %v574_v39 }
  0xd2   : > { %1272 = vrcp.f32 %v585_v38 }
  0xd4   : > { %v734_v62 = vpop.f32.mrf.mxu0 }
  0xd7   : > { %v1271_v42 = vpop.eup %1270 }
  0xd8   : > { %v576_v43 = vadd.f32 1.0, %v1271_v42  ;;  %v1273_v44 = vpop.eup %1272 }
  0xd9   : > { %v587_v48 = vmul.f32 %v1273_v44, %v1592_v2 }
  0xda   : > { %v577_v45 = vmul.f32 0.5, %v576_v43 }
  0xdb   : > { %v588_v54 = vpack.c.bf16 %v587_v48, %v587_v48 }
  0xdc   : > { %v578_v47 = vmul.f32 %v577_v45, %v567_v20  ;;  %v736_v5 = vpop.f32.mrf.mxu0  ;;  %v1197_v20 = vld [vmem:[#allocation5 + $0x30] sm:$0xff] }
  0xdd   : > { %886 = vmatpush.bf16.msrb.mxu3 %v1197_v20 }
  0xde   : > { %v579_v50 = vpack.c.bf16 %v578_v47, %v578_v47 }
  0xe0   : > { %v595_v53 = vsel %vm593_vm5, %v579_v50, 0 }
  0xe1   : > { %604 = vmatpush.bf16.msra.mxu1 %v595_v53  ;;  %887 = vmatpush.bf16.msrb.mxu3 %v1196_v21 }
  0xe4   : > { %1097 = vmatmul.msk.bf16.vlgmr.msra.gmra.mxu1 %vm589_vm6, %v588_v54 }
  0xe5   : > { %751 = vmatpush.bf16.msrb.mxu1 %v742_v52  ;;  %888 = vmatpush.bf16.msrb.mxu3 %v1195_v22 }
  0xe9   : > { %889 = vmatpush.bf16.msrb.mxu3 %v1194_v23 }
  0xed   : > { %890 = vmatpush.bf16.msrb.mxu3 %v1193_v24 }
  0xf1   : > { %891 = vmatpush.bf16.msrb.mxu3 %v1192_v25 }
  0xf4   : > { %1136 = vmatmul.msk.bf16.vlgmr.msrb.gmra.mxu1 %vm717_vm2, %v1625_v15 }
  0xf5   : > { %892 = vmatpush.bf16.msrb.mxu3 %v1191_v27 }
 0x161   : > { %v606_v59 = vpop.f32.mrf.mxu1 }
 0x162   : > { %v610_v60 = vpack.c.bf16 %v606_v59, %v606_v59 }
 0x164   : > { %684 = vmatmul.bf16.vlgmr.msra.gmra.mxu2 %v610_v60 }
 0x169   : > { %v608_v61 = vpop.f32.mrf.mxu1 }
 0x171   : > { %v753_v0 = vpop.f32.mrf.mxu1 }
 0x172   : > { %v754_v1 = vadd.f32 %v753_v0, %v734_v62 }
 0x174   : > { %v784_v2 = vadd.f32 %v779_v63, %v754_v1 }
 0x176   : > { %v790_v4 = vadd.f32 %v1269_v3, %v784_v2 }
 0x178   : > { %v792_v9 = vmax.f32 %v790_v4, 0.0 }
 0x179   : > { %v755_v6 = vpop.f32.mrf.mxu1 }
 0x17a   : > { %v756_v7 = vadd.f32 %v755_v6, %v736_v5  ;;  %v794_v12 = vpack.c.bf16 %v792_v9, %v792_v9 }
 0x17c   : > { %v785_v10 = vadd.f32 %v781_v8, %v756_v7  ;;  %v798_v15 = vunpack.c.l.b16 %v794_v12 }
 0x17e   : > { %v791_v11 = vadd.f32 %v1269_v3, %v785_v10 }
 0x180   : > { %v793_v13 = vmax.f32 %v791_v11, 0.0 }
 0x182   : > { %v795_v14 = vpack.c.bf16 %v793_v13, %v793_v13 }
 0x184   : > { %v799_v16 = vunpack.c.l.b16 %v795_v14 }
 0x186   : > { %v800_v17 = vpack.c.b16 %v799_v16, %v798_v15 }
 0x188   : > { %813 = vmatpush.bf16.msra.mxu1 %v800_v17 }
 0x18b   : > { %1139 = vmatmul.msk.bf16.vlgmr.msra.gmra.mxu1 %vm802_vm7, %v1442_v18 }
 0x1e7   : > { %v685_v28 = vpop.f32.mrf.mxu2 }
 0x1e8   : > { %v686_v29 = vadd.f32 %v685_v28, %v627_v26 }
 0x1ea   : > { %689 = vst [vmem:[%s467_s18] sm:$0x1] %v686_v29 }
 0x1ef   : > { %v687_v30 = vpop.f32.mrf.mxu2 }
 0x208   : > { %v815_v31 = vpop.f32.mrf.mxu1 }
 0x209   : > { %v819_v32 = vpack.c.bf16 %v815_v31, %v815_v31 }
 0x20b   : > { %893 = vmatmul.bf16.vlgmr.msrb.gmra.mxu3 %v819_v32 }
 0x210   : > { %v817_v33 = vpop.f32.mrf.mxu1 }
 0x211   : > { %1361 = shalt.err (!%p1358_p8)
}
 0x212   : > { %1208 = dma.vmem_to_hbm [thread:$0]  (%p1546_p5), %s915_s27, 16, %s917_s20, %s900_s1   ;;  %v836_v34 = vld [vmem:[%s1715_s10] sm:$0x1] }
 0x213   : > { %s925_s26 = scalar_lea.hbm %s1717_s12, %s1529_s25  ;;  %s473_s0 = scalar_lea.vmem [#allocation8], %s1648_s30 }
 0x214   : > { %s927_s2 = sshll.u32 %s473_s0, 4  ;;  %s929_s29 = sshll.u32 %s925_s26, 4  ;;  %s928_s2 = int_to_ptr.vmem [resolvable:$true] %s927_s2  ;;  %s930_s29 = int_to_ptr.hbm [resolvable:$true] %s929_s29 }
 0x215   : > { %s904_s16 = scalar_lea.sflag [#allocation9], %s1648_s30  ;;  %s1376_s15 = sshra.s32 %s930_s29, 4  ;;  %s1377_s15 = int_to_ptr.hbm [resolvable:$true] %s1376_s15 }
 0x216   : > { %s1378_s27 = scalar_lea.hbm %s1377_s15, 1  ;;  %s1382_s1 = scalar_lea.hbm %s1717_s12, 2 }
 0x217   : > { %p1379_p9 = scmp.ne.s32.totalorder %s1377_s15, %s1378_s27  ;;  %p1383_p12 = scmp.lt.s32.totalorder %s1377_s15, %s1717_s12 }
 0x218   : > { %p1384_p13 = scmp.lt.s32.totalorder %s1382_s1, %s1378_s27 }
 0x219   : > { %p1380_p10 = pnand %p1379_p9, %p1546_p5 }
 0x21a   : > { %p1385_p0 = por %p1384_p13, %p1383_p12 }
 0x21b   : > { %p1381_p11 = pneg %p1380_p10 }
 0x21d   : > { %p1386_p1 = pnand %p1385_p0, %p1381_p11 }
 0x28e   : > { %v894_v35 = vpop.f32.mrf.mxu3 }
 0x28f   : > { %v895_v36 = vadd.f32 %v894_v35, %v836_v34 }
 0x291   : > { %898 = vst [vmem:[%s473_s0] sm:$0x1] %v895_v36 }
 0x292   : > { %1389 = shalt.err (!%p1386_p1)
}
 0x293   : > { %1209 = dma.vmem_to_hbm [thread:$0]  (%p1546_p5), %s928_s2, 16, %s930_s29, %s904_s16  }
 0x296   : > { %v896_v37 = vpop.f32.mrf.mxu3 }
 0x297 PF: > { %p1230_p2 = scmp.ge.s32.totalorder %s1436_s24, 2  ;;  %s941_s30 = sand.u32 1, %s1424_s21  }
 0x298   : > { %s942_s19 = scalar_lea.sflag [#allocation4], %s941_s30 }
 0x299   : > { %p1220_p3 = pnand %p1230_p2, %p1550_p6 }
 0x29b   : > { %p1221_p4 = pneg %p1220_p3 }
 0x29d   : > { %1415 = dma.done.wait (%p1221_p4), %s942_s19, 16  }
 0x29e   : > { %1417 = vsyncadd (%p1221_p4), %s942_s19, 4294967280  ;;  %s951_s26 = scalar_lea.sflag [#allocation9], %s941_s30 }
 0x29f   : > { %1419 = dma.done.wait (%p1221_p4), %s951_s26, 16  }
 0x2a0   : > { %1421 = vsyncadd (%p1221_p4), %s951_s26, 4294967280  ;;  %s1733_s24 = sld [smem:[#allocation15_spill]]  ;;  %s1736_s21 = smov %s1428_s22 }
 0x2a1   : > { %s1734_s13 = sld [smem:[#allocation14_spill]] }
 0x2a2   : > { %s1735_s23 = sld [smem:[#allocation16_spill]] }
 0x2a6   : > { %p28_p5 = scmp.ge.s32.totalorder %s1733_s24, 4  }
 0x2a7   : > { %s1737_s22 = smov %s1734_s13 }
 0x2a8   :  { %30 = sbr.rel (!%p28_p5) target bundleno = 11 (0xb), region = 133 }
 0x2ad   :  { %956 = vsyncpa [#allocation3], 1 }
 0x2ae   :  { %958 = vsyncpa [#allocation3 + $0x1], 1 }
 0x2af   :  { %959 = vsyncpa [#allocation6], 1 }
 0x2b0   :  { %960 = vsyncpa [#allocation4], 1 }
 0x2b1   :  { %962 = vsyncpa [#allocation4 + $0x1], 1 }
 0x2b2   :  { %963 = vsyncpa [#allocation9], 1 }
 0x2b3   :  { %965 = vsyncpa [#allocation9 + $0x1], 1 }

</bundles_post_ra>
